<compile_context>
chip_gen: v7x
topology: tpu7x:2x2x1
jax: 0.10.0
libtpu: 0.0.40
codegen_flags: <defaults>
</compile_context>

<pallas_src>
import functools

import jax
import jax.numpy as jnp
from jax.experimental import pallas as pl
from jax.experimental.pallas import tpu as pltpu

BN_EPS = 1e-5
_MAX_TILE = 16384            # lanes per spatial tile (multiple of 128)
_MAX_FUSED_BYTES = 8 << 20   # x + y(f32) + out budget for the fused path


def _conv1x1(w, x, b=None):
    """w: (C_out, C_in), x: (C_in, T) f32, b: (C_out, 1) or None -> (C_out, T).

    C_in is tiny, so this is C_in broadcast multiply-adds on the VPU (no
    degenerate MXU pass); the result keeps the big spatial dim lane-dense.
    """
    c_in = x.shape[0]
    acc = w[:, 0:1] * x[0:1, :]
    for ci in range(1, c_in):
        acc = acc + w[:, ci:ci + 1] * x[ci:ci + 1, :]
    if b is not None:
        acc = acc + b
    return acc


# --------------------------------------------------------------------------- #
# Fused single-launch path (x, y and out resident in VMEM)
# --------------------------------------------------------------------------- #
def _make_fused_kernel(n, inv_m):
    def kernel(x_ref, w_ref, b_ref, g_ref, beta_ref, o_ref, y_ref):
        w = w_ref[...]
        b = b_ref[...]
        ssum = jnp.zeros_like(b)          # (C_out, 1)
        ssq = jnp.zeros_like(b)
        for bi in range(n):               # n is small by construction here
            y = _conv1x1(w, x_ref[bi].astype(jnp.float32), b)
            y_ref[bi] = y                 # keep y resident; no recompute
            ssum = ssum + jnp.sum(y, axis=1, keepdims=True)
            ssq = ssq + jnp.sum(y * y, axis=1, keepdims=True)
        mean = ssum * inv_m
        var = jnp.maximum(ssq * inv_m - mean * mean, 0.0)   # biased variance
        scale = g_ref[...] * jax.lax.rsqrt(var + BN_EPS)    # EUP
        shift = beta_ref[...] - mean * scale
        for bi in range(n):
            o_ref[bi] = jnp.maximum(y_ref[bi] * scale + shift,
                                    0.0).astype(o_ref.dtype)
    return kernel


# --------------------------------------------------------------------------- #
# Streaming two-pass path
# --------------------------------------------------------------------------- #
def _make_stats_kernel(hw, tile, tiles_per_split, needs_mask):
    # Per-(batch, split) partial sums of y0 = W @ x (bias intentionally
    # omitted: variance is shift-invariant and BN cancels the bias anyway).
    def kernel(x_ref, w_ref, sum_ref, sumsq_ref):
        @pl.when(pl.program_id(2) == 0)
        def _init():
            sum_ref[...] = jnp.zeros_like(sum_ref)
            sumsq_ref[...] = jnp.zeros_like(sumsq_ref)

        y = _conv1x1(w_ref[...], x_ref[...].astype(jnp.float32))   # (C_out, T)
        if needs_mask:
            start = (pl.program_id(1) * tiles_per_split + pl.program_id(2)) * tile
            lane = jax.lax.broadcasted_iota(jnp.int32, y.shape, 1)
            y = jnp.where(start + lane < hw, y, 0.0)   # drop padded tail lanes
        sum_ref[...] += jnp.sum(y, axis=1, keepdims=True)
        sumsq_ref[...] += jnp.sum(y * y, axis=1, keepdims=True)
    return kernel


def _apply_kernel(x_ref, w_ref, b_ref, o_ref):
    # BN scale/shift already folded into w/b: out = relu(W_fold @ x + b_fold).
    y = _conv1x1(w_ref[...], x_ref[...].astype(jnp.float32), b_ref[...])
    o_ref[...] = jnp.maximum(y, 0.0).astype(o_ref.dtype)


# --------------------------------------------------------------------------- #
# Wrapper
# --------------------------------------------------------------------------- #
def unet_grid_gating_signal2(x_nchw, weight, bias, gamma, beta,
                             max_fused_bytes=_MAX_FUSED_BYTES):
    """x_nchw: (N, C_in, H, W). weight: (C_out, C_in) 1x1 conv. bias/gamma/beta: (C_out,)."""
    n, c_in, h, w = x_nchw.shape
    c_out = weight.shape[0]
    hw = h * w
    m = n * hw
    itemsize = jnp.dtype(x_nchw.dtype).itemsize

    x3 = x_nchw.reshape(n, c_in, hw)                  # free reshape (contiguous NCHW)
    w_f32 = weight.astype(jnp.float32)                # (C_out, C_in)
    b_col = bias.astype(jnp.float32).reshape(c_out, 1)
    g_col = gamma.astype(jnp.float32).reshape(c_out, 1)
    beta_col = beta.astype(jnp.float32).reshape(c_out, 1)

    x_bytes = n * c_in * hw * itemsize
    out_bytes = n * c_out * hw * itemsize
    y_bytes = n * c_out * hw * 4

    # ---------------- Fused fast path ----------------
    if x_bytes + out_bytes + y_bytes <= max_fused_bytes:
        vmem_limit = int(max(2 * (x_bytes + out_bytes) + y_bytes + (4 << 20),
                             16 << 20))

        def full(shape):
            return pl.BlockSpec(shape, lambda i: (0,) * len(shape))

        out3 = pl.pallas_call(
            _make_fused_kernel(n, 1.0 / m),
            out_shape=jax.ShapeDtypeStruct((n, c_out, hw), x_nchw.dtype),
            grid=(1,),
            in_specs=[full((n, c_in, hw)), full((c_out, c_in)),
                      full((c_out, 1)), full((c_out, 1)), full((c_out, 1))],
            out_specs=full((n, c_out, hw)),
            scratch_shapes=[pltpu.VMEM((n, c_out, hw), jnp.float32)],
            compiler_params=pltpu.CompilerParams(
                dimension_semantics=("arbitrary",),
                vmem_limit_bytes=vmem_limit),
            cost_estimate=pl.CostEstimate(
                flops=2 * m * c_in * c_out + 8 * m * c_out,
                transcendentals=c_out,
                bytes_accessed=x_bytes + out_bytes),
        )(x3, w_f32, b_col, g_col, beta_col)
        return out3.reshape(n, c_out, h, w)

    # ---------------- Streaming two-pass path ----------------
    tile = hw if hw <= _MAX_TILE else _MAX_TILE       # tile is hw or mult. of 128
    num_tiles = pl.cdiv(hw, tile)
    needs_mask = (hw % tile) != 0
    splits = 2 if (num_tiles % 2 == 0 and num_tiles >= 2) else 1
    tiles_per_split = num_tiles // splits

    x_blk_bytes = c_in * tile * itemsize
    o_blk_bytes = c_out * tile * itemsize
    vmem_limit = int(min(max(4 * (x_blk_bytes + o_blk_bytes) + (2 << 20),
                             16 << 20), 32 << 20))

    # ---- Phase 1: per-channel sum / sum-of-squares of y0 = W @ x ----
    x_spec1 = pl.BlockSpec((None, c_in, tile),
                           lambda i, s, j: (i, 0, s * tiles_per_split + j))
    w_spec1 = pl.BlockSpec((c_out, c_in), lambda i, s, j: (0, 0))
    stat_spec = pl.BlockSpec((None, None, c_out, 1), lambda i, s, j: (i, s, 0, 0))

    sums, sumsqs = pl.pallas_call(
        _make_stats_kernel(hw, tile, tiles_per_split, needs_mask),
        out_shape=(jax.ShapeDtypeStruct((n, splits, c_out, 1), jnp.float32),
                   jax.ShapeDtypeStruct((n, splits, c_out, 1), jnp.float32)),
        grid=(n, splits, tiles_per_split),
        in_specs=[x_spec1, w_spec1],
        out_specs=(stat_spec, stat_spec),
        compiler_params=pltpu.CompilerParams(
            dimension_semantics=("parallel", "parallel", "arbitrary"),
            vmem_limit_bytes=vmem_limit),
        cost_estimate=pl.CostEstimate(
            flops=2 * m * c_in * c_out + 4 * m * c_out,
            transcendentals=0,
            bytes_accessed=x_bytes + 2 * n * splits * c_out * 4),
    )(x3, w_f32)

    # ---- Tiny XLA glue: global biased batch stats, fold BN into conv ----
    total_sum = jnp.sum(sums, axis=(0, 1))[:, 0]          # (C_out,)
    total_sumsq = jnp.sum(sumsqs, axis=(0, 1))[:, 0]
    mean0 = total_sum / m                                  # mean of y without bias
    var = jnp.maximum(total_sumsq / m - mean0 * mean0, 0.0)
    scale = gamma.astype(jnp.float32) * jax.lax.rsqrt(var + BN_EPS)
    w_fold = w_f32 * scale[:, None]                        # (C_out, C_in)
    # Conv bias cancels exactly under train-mode BN: b_fold = beta - mean0*scale.
    b_fold = (beta.astype(jnp.float32) - mean0 * scale).reshape(c_out, 1)

    # ---- Phase 2: recompute cheap conv with folded BN + ReLU ----
    out3 = pl.pallas_call(
        _apply_kernel,
        out_shape=jax.ShapeDtypeStruct((n, c_out, hw), x_nchw.dtype),
        grid=(n, num_tiles),
        in_specs=[pl.BlockSpec((None, c_in, tile), lambda i, j: (i, 0, j)),
                  pl.BlockSpec((c_out, c_in), lambda i, j: (0, 0)),
                  pl.BlockSpec((c_out, 1), lambda i, j: (0, 0))],
        out_specs=pl.BlockSpec((None, c_out, tile), lambda i, j: (i, 0, j)),
        compiler_params=pltpu.CompilerParams(
            dimension_semantics=("parallel", "parallel"),
            vmem_limit_bytes=vmem_limit),
        cost_estimate=pl.CostEstimate(
            flops=2 * m * c_in * c_out + 2 * m * c_out,
            transcendentals=0,
            bytes_accessed=x_bytes + out_bytes),
    )(x3, w_fold, b_fold)

    return out3.reshape(n, c_out, h, w)


def _reference(x, weight, bias, gamma, beta):
    # Pure-JAX reference: 1x1 conv + train-mode BN (biased var) + ReLU, NCHW.
    y = jnp.einsum("nchw,oc->nohw", x, weight) + bias[None, :, None, None]
    mean = jnp.mean(y, axis=(0, 2, 3))
    var = jnp.mean((y - mean[None, :, None, None]) ** 2, axis=(0, 2, 3))
    y_hat = (y - mean[None, :, None, None]) * jax.lax.rsqrt(var + BN_EPS)[None, :, None, None]
    out = y_hat * gamma[None, :, None, None] + beta[None, :, None, None]
    return jnp.maximum(out, 0.0)


if __name__ == "__main__":
    key = jax.random.PRNGKey(0)
    k_x, k_w, k_b, k_g, k_be, k_x2 = jax.random.split(key, 6)

    # Module config: in_size=4, out_size=8, kernel_size=(1,1), is_batchnorm=True
    N, C_IN, H, W = 2, 4, 16, 16
    C_OUT = 8

    x = jax.random.normal(k_x, (N, C_IN, H, W), dtype=jnp.float32)
    bound = 1.0 / (C_IN ** 0.5)                 # PyTorch-style uniform bound
    conv_w = jax.random.uniform(k_w, (C_OUT, C_IN), jnp.float32, -bound, bound)
    conv_b = jax.random.uniform(k_b, (C_OUT,), jnp.float32, -bound, bound)
    bn_gamma = 1.0 + 0.1 * jax.random.normal(k_g, (C_OUT,), jnp.float32)
    bn_beta = 0.1 * jax.random.normal(k_be, (C_OUT,), jnp.float32)

    fused_fn = jax.jit(unet_grid_gating_signal2)
    two_pass_fn = jax.jit(functools.partial(unet_grid_gating_signal2,
                                            max_fused_bytes=0))

    # 1) Small shape -> fused single-kernel path.
    out_fused = fused_fn(x, conv_w, conv_b, bn_gamma, bn_beta)
    # 2) Same shape, forced streaming two-pass path.
    out_two = two_pass_fn(x, conv_w, conv_b, bn_gamma, bn_beta)
    jax.block_until_ready((out_fused, out_two))

    ref = _reference(x, conv_w, conv_b, bn_gamma, bn_beta)
    assert out_fused.shape == (N, C_OUT, H, W)
    assert jnp.allclose(out_fused, ref, atol=1e-4, rtol=1e-3), \
        float(jnp.max(jnp.abs(out_fused - ref)))
    assert jnp.allclose(out_two, ref, atol=1e-4, rtol=1e-3), \
        float(jnp.max(jnp.abs(out_two - ref)))

    # 3) Larger, non-128-aligned spatial extent (hw = 20735 > tile cap):
    #    exercises the multi-tile, split-grid, masked-tail streaming path.
    H2, W2 = 143, 145
    x2 = jax.random.normal(k_x2, (1, C_IN, H2, W2), dtype=jnp.float32)
    out2 = two_pass_fn(x2, conv_w, conv_b, bn_gamma, bn_beta)
    jax.block_until_ready(out2)
    ref2 = _reference(x2, conv_w, conv_b, bn_gamma, bn_beta)
    assert jnp.allclose(out2, ref2, atol=1e-4, rtol=1e-3), \
        float(jnp.max(jnp.abs(out2 - ref2)))

    print("KERNEL_OK")
</pallas_src>

<mosaic_0001>
module attributes {stable_mosaic.version = 11 : i64} {
  func.func @kernel(%arg0: i32, %arg1: memref<2x4x256xf32, #tpu.memory_space<vmem>>, %arg2: memref<8x4xf32, #tpu.memory_space<vmem>>, %arg3: memref<8x1xf32, #tpu.memory_space<vmem>>, %arg4: memref<8x1xf32, #tpu.memory_space<vmem>>, %arg5: memref<8x1xf32, #tpu.memory_space<vmem>>, %arg6: memref<2x8x256xf32, #tpu.memory_space<vmem>>, %arg7: memref<2x8x256xf32, #tpu.memory_space<vmem>>) attributes {dimension_semantics = [#tpu.dimension_semantics<arbitrary>], iteration_bounds = array<i64: 1>, scalar_prefetch = 0 : i64, scratch_operands = 1 : i64, tpu.core_type = #tpu.core_type<tc>, window_params = [{pipeline_mode = #tpu.pipeline_mode<synchronous>, transform_indices = @transform_0, window_bounds = array<i64: 2, 4, 256>}, {pipeline_mode = #tpu.pipeline_mode<synchronous>, transform_indices = @transform_1, window_bounds = array<i64: 8, 4>}, {pipeline_mode = #tpu.pipeline_mode<synchronous>, transform_indices = @transform_2, window_bounds = array<i64: 8, 1>}, {pipeline_mode = #tpu.pipeline_mode<synchronous>, transform_indices = @transform_3, window_bounds = array<i64: 8, 1>}, {pipeline_mode = #tpu.pipeline_mode<synchronous>, transform_indices = @transform_4, window_bounds = array<i64: 8, 1>}, {pipeline_mode = #tpu.pipeline_mode<synchronous>, transform_indices = @transform_5, window_bounds = array<i64: 2, 8, 256>}]} {
    %c0 = arith.constant 0 : index
    %c0_0 = arith.constant 0 : index
    %0 = vector.load %arg2[%c0, %c0_0] : memref<8x4xf32, #tpu.memory_space<vmem>>, vector<8x4xf32>
    %c0_1 = arith.constant 0 : index
    %c0_2 = arith.constant 0 : index
    %1 = vector.load %arg3[%c0_1, %c0_2] : memref<8x1xf32, #tpu.memory_space<vmem>>, vector<8x1xf32>
    %cst = arith.constant 0.000000e+00 : f32
    %2 = vector.broadcast %cst : f32 to vector<8x1xf32>
    %cst_3 = arith.constant 0.000000e+00 : f32
    %3 = vector.broadcast %cst_3 : f32 to vector<8x1xf32>
    %c0_4 = arith.constant 0 : index
    %c0_5 = arith.constant 0 : index
    %c0_6 = arith.constant 0 : index
    %4 = vector.load %arg1[%c0_4, %c0_5, %c0_6] : memref<2x4x256xf32, #tpu.memory_space<vmem>>, vector<1x4x256xf32>
    %5 = vector.shape_cast %4 : vector<1x4x256xf32> to vector<4x256xf32>
    %6 = vector.extract_strided_slice %0 {offsets = [0, 0], sizes = [8, 1], strides = [1, 1]} : vector<8x4xf32> to vector<8x1xf32>
    %7 = vector.extract_strided_slice %5 {offsets = [0, 0], sizes = [1, 256], strides = [1, 1]} : vector<4x256xf32> to vector<1x256xf32>
    %8 = vector.broadcast %6 : vector<8x1xf32> to vector<8x256xf32>
    %9 = vector.broadcast %7 : vector<1x256xf32> to vector<8x256xf32>
    %10 = arith.mulf %8, %9 : vector<8x256xf32>
    %11 = vector.extract_strided_slice %0 {offsets = [0, 1], sizes = [8, 1], strides = [1, 1]} : vector<8x4xf32> to vector<8x1xf32>
    %12 = vector.extract_strided_slice %5 {offsets = [1, 0], sizes = [1, 256], strides = [1, 1]} : vector<4x256xf32> to vector<1x256xf32>
    %13 = vector.broadcast %11 : vector<8x1xf32> to vector<8x256xf32>
    %14 = vector.broadcast %12 : vector<1x256xf32> to vector<8x256xf32>
    %15 = arith.mulf %13, %14 : vector<8x256xf32>
    %16 = arith.addf %10, %15 : vector<8x256xf32>
    %17 = vector.extract_strided_slice %0 {offsets = [0, 2], sizes = [8, 1], strides = [1, 1]} : vector<8x4xf32> to vector<8x1xf32>
    %18 = vector.extract_strided_slice %5 {offsets = [2, 0], sizes = [1, 256], strides = [1, 1]} : vector<4x256xf32> to vector<1x256xf32>
    %19 = vector.broadcast %17 : vector<8x1xf32> to vector<8x256xf32>
    %20 = vector.broadcast %18 : vector<1x256xf32> to vector<8x256xf32>
    %21 = arith.mulf %19, %20 : vector<8x256xf32>
    %22 = arith.addf %16, %21 : vector<8x256xf32>
    %23 = vector.extract_strided_slice %0 {offsets = [0, 3], sizes = [8, 1], strides = [1, 1]} : vector<8x4xf32> to vector<8x1xf32>
    %24 = vector.extract_strided_slice %5 {offsets = [3, 0], sizes = [1, 256], strides = [1, 1]} : vector<4x256xf32> to vector<1x256xf32>
    %25 = vector.broadcast %23 : vector<8x1xf32> to vector<8x256xf32>
    %26 = vector.broadcast %24 : vector<1x256xf32> to vector<8x256xf32>
    %27 = arith.mulf %25, %26 : vector<8x256xf32>
    %28 = arith.addf %22, %27 : vector<8x256xf32>
    %29 = vector.broadcast %1 : vector<8x1xf32> to vector<8x256xf32>
    %30 = arith.addf %28, %29 : vector<8x256xf32>
    %c0_7 = arith.constant 0 : index
    %c0_8 = arith.constant 0 : index
    %c0_9 = arith.constant 0 : index
    %31 = vector.load %arg7[%c0_7, %c0_8, %c0_9] : memref<2x8x256xf32, #tpu.memory_space<vmem>>, vector<1x8x256xf32>
    %32 = vector.shape_cast %31 : vector<1x8x256xf32> to vector<8x256xf32>
    %33 = vector.shape_cast %30 : vector<8x256xf32> to vector<1x8x256xf32>
    tpu.vector_store %arg7[%c0_7, %c0_8, %c0_9], %33 {strides = array<i32>} : memref<2x8x256xf32, #tpu.memory_space<vmem>>, vector<1x8x256xf32>,
    %cst_10 = arith.constant dense<0.000000e+00> : vector<8xf32>
    %34 = vector.multi_reduction <add>, %30, %cst_10 [1] : vector<8x256xf32> to vector<8xf32>
    %35 = vector.shape_cast %34 : vector<8xf32> to vector<8x1xf32>
    %36 = arith.addf %2, %35 : vector<8x1xf32>
    %37 = arith.mulf %30, %30 : vector<8x256xf32>
    %cst_11 = arith.constant dense<0.000000e+00> : vector<8xf32>
    %38 = vector.multi_reduction <add>, %37, %cst_11 [1] : vector<8x256xf32> to vector<8xf32>
    %39 = vector.shape_cast %38 : vector<8xf32> to vector<8x1xf32>
    %40 = arith.addf %3, %39 : vector<8x1xf32>
    %c1 = arith.constant 1 : index
    %c0_12 = arith.constant 0 : index
    %c0_13 = arith.constant 0 : index
    %41 = vector.load %arg1[%c1, %c0_12, %c0_13] : memref<2x4x256xf32, #tpu.memory_space<vmem>>, vector<1x4x256xf32>
    %42 = vector.shape_cast %41 : vector<1x4x256xf32> to vector<4x256xf32>
    %43 = vector.extract_strided_slice %0 {offsets = [0, 0], sizes = [8, 1], strides = [1, 1]} : vector<8x4xf32> to vector<8x1xf32>
    %44 = vector.extract_strided_slice %42 {offsets = [0, 0], sizes = [1, 256], strides = [1, 1]} : vector<4x256xf32> to vector<1x256xf32>
    %45 = vector.broadcast %43 : vector<8x1xf32> to vector<8x256xf32>
    %46 = vector.broadcast %44 : vector<1x256xf32> to vector<8x256xf32>
    %47 = arith.mulf %45, %46 : vector<8x256xf32>
    %48 = vector.extract_strided_slice %0 {offsets = [0, 1], sizes = [8, 1], strides = [1, 1]} : vector<8x4xf32> to vector<8x1xf32>
    %49 = vector.extract_strided_slice %42 {offsets = [1, 0], sizes = [1, 256], strides = [1, 1]} : vector<4x256xf32> to vector<1x256xf32>
    %50 = vector.broadcast %48 : vector<8x1xf32> to vector<8x256xf32>
    %51 = vector.broadcast %49 : vector<1x256xf32> to vector<8x256xf32>
    %52 = arith.mulf %50, %51 : vector<8x256xf32>
    %53 = arith.addf %47, %52 : vector<8x256xf32>
    %54 = vector.extract_strided_slice %0 {offsets = [0, 2], sizes = [8, 1], strides = [1, 1]} : vector<8x4xf32> to vector<8x1xf32>
    %55 = vector.extract_strided_slice %42 {offsets = [2, 0], sizes = [1, 256], strides = [1, 1]} : vector<4x256xf32> to vector<1x256xf32>
    %56 = vector.broadcast %54 : vector<8x1xf32> to vector<8x256xf32>
    %57 = vector.broadcast %55 : vector<1x256xf32> to vector<8x256xf32>
    %58 = arith.mulf %56, %57 : vector<8x256xf32>
    %59 = arith.addf %53, %58 : vector<8x256xf32>
    %60 = vector.extract_strided_slice %0 {offsets = [0, 3], sizes = [8, 1], strides = [1, 1]} : vector<8x4xf32> to vector<8x1xf32>
    %61 = vector.extract_strided_slice %42 {offsets = [3, 0], sizes = [1, 256], strides = [1, 1]} : vector<4x256xf32> to vector<1x256xf32>
    %62 = vector.broadcast %60 : vector<8x1xf32> to vector<8x256xf32>
    %63 = vector.broadcast %61 : vector<1x256xf32> to vector<8x256xf32>
    %64 = arith.mulf %62, %63 : vector<8x256xf32>
    %65 = arith.addf %59, %64 : vector<8x256xf32>
    %66 = vector.broadcast %1 : vector<8x1xf32> to vector<8x256xf32>
    %67 = arith.addf %65, %66 : vector<8x256xf32>
    %c1_14 = arith.constant 1 : index
    %c0_15 = arith.constant 0 : index
    %c0_16 = arith.constant 0 : index
    %68 = vector.load %arg7[%c1_14, %c0_15, %c0_16] : memref<2x8x256xf32, #tpu.memory_space<vmem>>, vector<1x8x256xf32>
    %69 = vector.shape_cast %68 : vector<1x8x256xf32> to vector<8x256xf32>
    %70 = vector.shape_cast %67 : vector<8x256xf32> to vector<1x8x256xf32>
    tpu.vector_store %arg7[%c1_14, %c0_15, %c0_16], %70 {strides = array<i32>} : memref<2x8x256xf32, #tpu.memory_space<vmem>>, vector<1x8x256xf32>,
    %cst_17 = arith.constant dense<0.000000e+00> : vector<8xf32>
    %71 = vector.multi_reduction <add>, %67, %cst_17 [1] : vector<8x256xf32> to vector<8xf32>
    %72 = vector.shape_cast %71 : vector<8xf32> to vector<8x1xf32>
    %73 = arith.addf %36, %72 : vector<8x1xf32>
    %74 = arith.mulf %67, %67 : vector<8x256xf32>
    %cst_18 = arith.constant dense<0.000000e+00> : vector<8xf32>
    %75 = vector.multi_reduction <add>, %74, %cst_18 [1] : vector<8x256xf32> to vector<8xf32>
    %76 = vector.shape_cast %75 : vector<8xf32> to vector<8x1xf32>
    %77 = arith.addf %40, %76 : vector<8x1xf32>
    %cst_19 = arith.constant 0.001953125 : f32
    %78 = vector.broadcast %cst_19 : f32 to vector<8x1xf32>
    %79 = arith.mulf %73, %78 : vector<8x1xf32>
    %cst_20 = arith.constant 0.001953125 : f32
    %80 = vector.broadcast %cst_20 : f32 to vector<8x1xf32>
    %81 = arith.mulf %77, %80 : vector<8x1xf32>
    %82 = arith.mulf %79, %79 : vector<8x1xf32>
    %83 = arith.subf %81, %82 : vector<8x1xf32>
    %cst_21 = arith.constant 0.000000e+00 : f32
    %84 = vector.broadcast %cst_21 : f32 to vector<8x1xf32>
    %85 = arith.maximumf %83, %84 : vector<8x1xf32>
    %c0_22 = arith.constant 0 : index
    %c0_23 = arith.constant 0 : index
    %86 = vector.load %arg4[%c0_22, %c0_23] : memref<8x1xf32, #tpu.memory_space<vmem>>, vector<8x1xf32>
    %cst_24 = arith.constant 9.99999974E-6 : f32
    %87 = vector.broadcast %cst_24 : f32 to vector<8x1xf32>
    %88 = arith.addf %85, %87 : vector<8x1xf32>
    %89 = math.rsqrt %88 : vector<8x1xf32>
    %90 = arith.mulf %86, %89 : vector<8x1xf32>
    %c0_25 = arith.constant 0 : index
    %c0_26 = arith.constant 0 : index
    %91 = vector.load %arg5[%c0_25, %c0_26] : memref<8x1xf32, #tpu.memory_space<vmem>>, vector<8x1xf32>
    %92 = arith.mulf %79, %90 : vector<8x1xf32>
    %93 = arith.subf %91, %92 : vector<8x1xf32>
    %c0_27 = arith.constant 0 : index
    %c0_28 = arith.constant 0 : index
    %c0_29 = arith.constant 0 : index
    %94 = vector.load %arg7[%c0_27, %c0_28, %c0_29] : memref<2x8x256xf32, #tpu.memory_space<vmem>>, vector<1x8x256xf32>
    %95 = vector.shape_cast %94 : vector<1x8x256xf32> to vector<8x256xf32>
    %96 = vector.broadcast %90 : vector<8x1xf32> to vector<8x256xf32>
    %97 = arith.mulf %95, %96 : vector<8x256xf32>
    %98 = vector.broadcast %93 : vector<8x1xf32> to vector<8x256xf32>
    %99 = arith.addf %97, %98 : vector<8x256xf32>
    %cst_30 = arith.constant 0.000000e+00 : f32
    %100 = vector.broadcast %cst_30 : f32 to vector<8x256xf32>
    %101 = arith.maximumf %99, %100 : vector<8x256xf32>
    %c0_31 = arith.constant 0 : index
    %c0_32 = arith.constant 0 : index
    %c0_33 = arith.constant 0 : index
    %102 = vector.load %arg6[%c0_31, %c0_32, %c0_33] : memref<2x8x256xf32, #tpu.memory_space<vmem>>, vector<1x8x256xf32>
    %103 = vector.shape_cast %102 : vector<1x8x256xf32> to vector<8x256xf32>
    %104 = vector.shape_cast %101 : vector<8x256xf32> to vector<1x8x256xf32>
    tpu.vector_store %arg6[%c0_31, %c0_32, %c0_33], %104 {strides = array<i32>} : memref<2x8x256xf32, #tpu.memory_space<vmem>>, vector<1x8x256xf32>,
    %c1_34 = arith.constant 1 : index
    %c0_35 = arith.constant 0 : index
    %c0_36 = arith.constant 0 : index
    %105 = vector.load %arg7[%c1_34, %c0_35, %c0_36] : memref<2x8x256xf32, #tpu.memory_space<vmem>>, vector<1x8x256xf32>
    %106 = vector.shape_cast %105 : vector<1x8x256xf32> to vector<8x256xf32>
    %107 = vector.broadcast %90 : vector<8x1xf32> to vector<8x256xf32>
    %108 = arith.mulf %106, %107 : vector<8x256xf32>
    %109 = vector.broadcast %93 : vector<8x1xf32> to vector<8x256xf32>
    %110 = arith.addf %108, %109 : vector<8x256xf32>
    %cst_37 = arith.constant 0.000000e+00 : f32
    %111 = vector.broadcast %cst_37 : f32 to vector<8x256xf32>
    %112 = arith.maximumf %110, %111 : vector<8x256xf32>
    %c1_38 = arith.constant 1 : index
    %c0_39 = arith.constant 0 : index
    %c0_40 = arith.constant 0 : index
    %113 = vector.load %arg6[%c1_38, %c0_39, %c0_40] : memref<2x8x256xf32, #tpu.memory_space<vmem>>, vector<1x8x256xf32>
    %114 = vector.shape_cast %113 : vector<1x8x256xf32> to vector<8x256xf32>
    %115 = vector.shape_cast %112 : vector<8x256xf32> to vector<1x8x256xf32>
    tpu.vector_store %arg6[%c1_38, %c0_39, %c0_40], %115 {strides = array<i32>} : memref<2x8x256xf32, #tpu.memory_space<vmem>>, vector<1x8x256xf32>,
    return
  }
  func.func @transform_0(%arg0: i32) -> (i32, i32, i32) {
    %c0_i32 = arith.constant 0 : i32
    %c0_i32_0 = arith.constant 0 : i32
    %c0_i32_1 = arith.constant 0 : i32
    %c0_i32_2 = arith.constant 0 : i32
    return %c0_i32, %c0_i32_0, %c0_i32_1 : i32, i32, i32
  }
  func.func @transform_1(%arg0: i32) -> (i32, i32) {
    %c0_i32 = arith.constant 0 : i32
    %c0_i32_0 = arith.constant 0 : i32
    %c0_i32_1 = arith.constant 0 : i32
    return %c0_i32, %c0_i32_0 : i32, i32
  }
  func.func @transform_2(%arg0: i32) -> (i32, i32) {
    %c0_i32 = arith.constant 0 : i32
    %c0_i32_0 = arith.constant 0 : i32
    %c0_i32_1 = arith.constant 0 : i32
    return %c0_i32, %c0_i32_0 : i32, i32
  }
  func.func @transform_3(%arg0: i32) -> (i32, i32) {
    %c0_i32 = arith.constant 0 : i32
    %c0_i32_0 = arith.constant 0 : i32
    %c0_i32_1 = arith.constant 0 : i32
    return %c0_i32, %c0_i32_0 : i32, i32
  }
  func.func @transform_4(%arg0: i32) -> (i32, i32) {
    %c0_i32 = arith.constant 0 : i32
    %c0_i32_0 = arith.constant 0 : i32
    %c0_i32_1 = arith.constant 0 : i32
    return %c0_i32, %c0_i32_0 : i32, i32
  }
  func.func @transform_5(%arg0: i32) -> (i32, i32, i32) {
    %c0_i32 = arith.constant 0 : i32
    %c0_i32_0 = arith.constant 0 : i32
    %c0_i32_1 = arith.constant 0 : i32
    %c0_i32_2 = arith.constant 0 : i32
    return %c0_i32, %c0_i32_0, %c0_i32_1 : i32, i32, i32
  }
}

</mosaic_0001>

<bundles_post_ra>
// kernel: unet_grid_gating_signal2.1
= control target key start
LH: loop header
LB: loop body
LE: loop exit
PB: predicated region body
PF: predicated region fallthrough
CT: control target
= control target key end

     0   :  { %v312_v0 = vmov 0   ;;  %v313_v2 = vmov 2   ;;  %v314_v3 = vmov 1   ;;  %v315_v4 = vmov 3   ;;  %s376_s1 = inlined_call_operand.vmem [shape: f32[8,4], index: 1, kind: input, shape index: {}]   ;;  %s377_s2 = inlined_call_operand.vmem [shape: f32[8,1], index: 2, kind: input, shape index: {}]   ;;  %s378_s0 = inlined_call_operand.vmem [shape: f32[2,4,256], index: 0, kind: input, shape index: {}]   ;;  %s379_s3 = inlined_call_operand.vmem [shape: f32[8,1], index: 3, kind: input, shape index: {}]   ;;  %s380_s4 = inlined_call_operand.vmem [shape: f32[8,1], index: 4, kind: input, shape index: {}]   ;;  %s381_s5 = inlined_call_operand.vmem [shape: f32[2,8,256], index: 5, kind: output, shape index: {}]  }
   0x1   :  { %304 = vset.pattern.permute.xlu0 %v312_v0  ;;  %v20_v1 = vld [vmem:[%s376_s1] sm:$0xff]  ;;  %306 = vset.pattern.permute.xlu1 %v313_v2  ;;  %v29_v6 = vlaneseq  ;;  %v297_v11 = vld [vmem:[%s378_s0 + $0x8] sm:$0xff] }
   0x2   :  { %25 = vperm.xlu0 %304, %v20_v1   ;;  %76 = vperm.xlu1 %306, %v20_v1   ;;  %v21_v5 = vld [vmem:[%s377_s2] sm:$0xff] }
   0x3   :  { %v30_v7 = vshrl.u32 %v29_v6, 7  ;;  %v22_v10 = vld [vmem:[%s378_s0] sm:$0xff] }
   0x5   :  { %v31_v8 = vsub.s32 0, %v30_v7  ;;  %v35_v9 = vsub.s32 4, %v30_v7  ;;  %v81_v12 = vsub.s32 2, %v30_v7  ;;  %v85_v13 = vsub.s32 6, %v30_v7 }
   0x6   :  { %305 = vset.pattern.permute.xlu0 %v314_v3  ;;  %307 = vset.pattern.permute.xlu1 %v315_v4  ;;  %v55_v14 = vsub.s32 1, %v30_v7  ;;  %v59_v15 = vsub.s32 5, %v30_v7  ;;  %v107_v16 = vsub.s32 3, %v30_v7  ;;  %v111_v17 = vsub.s32 7, %v30_v7 }
   0x7   :  { %50 = vperm.xlu0 %305, %v20_v1   ;;  %102 = vperm.xlu1 %307, %v20_v1   ;;  %v32_v18 = vrot.slane %v22_v10, %v31_v8  ;;  %v36_v19 = vrot.slane %v22_v10, %v35_v9  ;;  %v152_v20 = vrot.slane %v297_v11, %v31_v8 }
   0x8   :  { %v156_v21 = vrot.slane %v297_v11, %v35_v9  ;;  %v82_v22 = vrot.slane %v22_v10, %v81_v12  ;;  %v86_v23 = vrot.slane %v22_v10, %v85_v13  ;;  %v194_v24 = vrot.slane %v297_v11, %v81_v12 }
   0x9   :  { %v198_v25 = vrot.slane %v297_v11, %v85_v13  ;;  %v56_v26 = vrot.slane %v22_v10, %v55_v14  ;;  %v60_v27 = vrot.slane %v22_v10, %v59_v15  ;;  %v172_v28 = vrot.slane %v297_v11, %v55_v14 }
   0xa   :  { %v176_v29 = vrot.slane %v297_v11, %v59_v15  ;;  %v108_v30 = vrot.slane %v22_v10, %v107_v16  ;;  %v112_v31 = vrot.slane %v22_v10, %v111_v17  ;;  %v216_v32 = vrot.slane %v297_v11, %v107_v16 }
   0xb   :  { %308 = vset.pattern.permute.xlu1 %v312_v0  ;;  %309 = vset.pattern.permute.xlu0 %v312_v0  ;;  %v220_v33 = vrot.slane %v297_v11, %v111_v17  ;;  %v42_v35 = vrot.slane %v32_v18, %v31_v8  ;;  %v46_v36 = vrot.slane %v36_v19, %v31_v8 }
   0xc   :  { %129 = vperm.xlu1 %308, %v21_v5   ;;  %v162_v37 = vrot.slane %v152_v20, %v31_v8  ;;  %v166_v38 = vrot.slane %v156_v21, %v31_v8  ;;  %v92_v40 = vrot.slane %v82_v22, %v81_v12  ;;  %v96_v41 = vrot.slane %v86_v23, %v81_v12 }
   0xd   :  { %v204_v42 = vrot.slane %v194_v24, %v81_v12  ;;  %v208_v43 = vrot.slane %v198_v25, %v81_v12  ;;  %v66_v44 = vrot.slane %v56_v26, %v55_v14  ;;  %v70_v45 = vrot.slane %v60_v27, %v55_v14 }
   0xe   :  { %v182_v46 = vrot.slane %v172_v28, %v55_v14  ;;  %v186_v47 = vrot.slane %v176_v29, %v55_v14  ;;  %v118_v48 = vrot.slane %v108_v30, %v107_v16  ;;  %v122_v49 = vrot.slane %v112_v31, %v107_v16 }
   0xf   :  { %v226_v50 = vrot.slane %v216_v32, %v107_v16  ;;  %v230_v51 = vrot.slane %v220_v33, %v107_v16 }
  0x81   :  { %v26_v34 = vpop.permute.xlu0 %25  ;;  %v77_v39 = vpop.permute.xlu1 %76 }
  0x82   :  { %v47_v52 = vmul.f32 %v42_v35, %v26_v34  ;;  %v48_v53 = vmul.f32 %v46_v36, %v26_v34  ;;  %v167_v54 = vmul.f32 %v162_v37, %v26_v34  ;;  %v168_v55 = vmul.f32 %v166_v38, %v26_v34 }
  0x83   :  { %v97_v56 = vmul.f32 %v92_v40, %v77_v39  ;;  %v98_v57 = vmul.f32 %v96_v41, %v77_v39  ;;  %v209_v58 = vmul.f32 %v204_v42, %v77_v39  ;;  %v210_v59 = vmul.f32 %v208_v43, %v77_v39  ;;  %v255_v43 = vld [vmem:[%s379_s3] sm:$0xff] }
  0x86   :  { %v51_v60 = vpop.permute.xlu0 %50  ;;  %v103_v61 = vpop.permute.xlu1 %102 }
  0x87   :  { %v71_v62 = vmul.f32 %v66_v44, %v51_v60  ;;  %v72_v63 = vmul.f32 %v70_v45, %v51_v60  ;;  %v187_v0 = vmul.f32 %v182_v46, %v51_v60  ;;  %v188_v1 = vmul.f32 %v186_v47, %v51_v60  ;;  %v259_v46 = vld [vmem:[%s380_s4] sm:$0xff] }
  0x88   :  { %v123_v2 = vmul.f32 %v118_v48, %v103_v61  ;;  %v124_v3 = vmul.f32 %v122_v49, %v103_v61  ;;  %v231_v4 = vmul.f32 %v226_v50, %v103_v61  ;;  %v232_v5 = vmul.f32 %v230_v51, %v103_v61 }
  0x89   :  { %v73_v6 = vadd.f32 %v71_v62, %v47_v52  ;;  %v74_v7 = vadd.f32 %v72_v63, %v48_v53  ;;  %v189_v8 = vadd.f32 %v187_v0, %v167_v54  ;;  %v190_v9 = vadd.f32 %v188_v1, %v168_v55 }
  0x8b   :  { %v99_v10 = vadd.f32 %v97_v56, %v73_v6  ;;  %v100_v11 = vadd.f32 %v98_v57, %v74_v7  ;;  %v211_v12 = vadd.f32 %v209_v58, %v189_v8  ;;  %v212_v13 = vadd.f32 %v210_v59, %v190_v9  ;;  %v130_v14 = vpop.permute.xlu1 %129 }
  0x8d   :  { %v125_v15 = vadd.f32 %v123_v2, %v99_v10  ;;  %v126_v16 = vadd.f32 %v124_v3, %v100_v11  ;;  %v233_v17 = vadd.f32 %v231_v4, %v211_v12  ;;  %v234_v18 = vadd.f32 %v232_v5, %v212_v13 }
  0x8f   :  { %v132_v19 = vadd.f32 %v130_v14, %v125_v15  ;;  %v133_v20 = vadd.f32 %v130_v14, %v126_v16  ;;  %v235_v21 = vadd.f32 %v233_v17, %v130_v14  ;;  %v236_v22 = vadd.f32 %v234_v18, %v130_v14 }
  0x91   :  { %v240_v23 = vadd.f32 %v236_v22, %v235_v21  ;;  %v136_v24 = vadd.f32 %v133_v20, %v132_v19  ;;  %v140_v25 = vmul.f32 %v132_v19, %v132_v19  ;;  %v141_v26 = vmul.f32 %v133_v20, %v133_v20 }
  0x92   :  { %v244_v28 = vmul.f32 %v235_v21, %v235_v21  ;;  %v245_v29 = vmul.f32 %v236_v22, %v236_v22 }
  0x93   :  { %241 = vadd.xlane.f32.xlu1 %v240_v23  ;;  %137 = vadd.xlane.f32.xlu0 %v136_v24  ;;  %v142_v27 = vadd.f32 %v141_v26, %v140_v25 }
  0x94   :  { %v246_v30 = vadd.f32 %v245_v29, %v244_v28 }
  0x97   :  { %143 = vadd.xlane.f32.xlu0 %v142_v27 }
  0x9b   :  { %247 = vadd.xlane.f32.xlu0 %v246_v30 }
 0x120   :  { %v242_v31 = vpop.xlane.xlu1 %241  ;;  %v138_v32 = vpop.xlane.xlu0 %137 }
 0x121   :  { %v243_v33 = vadd.f32 %v242_v31, %v138_v32 }
 0x123   :  { %v250_v35 = vmul.f32 0.001953125, %v243_v33 }
 0x124   :  { %v144_v34 = vpop.xlane.xlu0 %143 }
 0x125   :  { %v252_v38 = vmul.f32 %v250_v35, %v250_v35 }
 0x128   :  { %v248_v36 = vpop.xlane.xlu0 %247 }
 0x129   :  { %v249_v37 = vadd.f32 %v248_v36, %v144_v34 }
 0x12b   :  { %v251_v39 = vmul.f32 0.001953125, %v249_v37 }
 0x12d   :  { %v253_v40 = vsub.f32 %v251_v39, %v252_v38 }
 0x12f   :  { %v254_v41 = vmax.f32 %v253_v40, 0.0 }
 0x131   :  { %v256_v42 = vadd.f32 1e-05, %v254_v41 }
 0x133   :  { %310 = vrsqrt.f32 %v256_v42 }
 0x13d   :  { %v311_v44 = vpop.eup %310 }
 0x13e   :  { %v258_v45 = vmul.f32 %v311_v44, %v255_v43 }
 0x140   :  { %266 = vperm.xlu1 %308, %v258_v45   ;;  %v260_v47 = vmul.f32 %v258_v45, %v250_v35 }
 0x142   :  { %v261_v48 = vsub.f32 %v259_v46, %v260_v47 }
 0x144   :  { %273 = vperm.xlu0 %309, %v261_v48  }
 0x1bf   :  { %v267_v49 = vpop.permute.xlu1 %266 }
 0x1c0   :  { %v269_v50 = vmul.f32 %v267_v49, %v132_v19  ;;  %v270_v51 = vmul.f32 %v267_v49, %v133_v20  ;;  %v284_v52 = vmul.f32 %v267_v49, %v235_v21  ;;  %v285_v53 = vmul.f32 %v267_v49, %v236_v22 }
 0x1c3   :  { %v274_v54 = vpop.permute.xlu0 %273 }
 0x1c4   :  { %v276_v55 = vadd.f32 %v274_v54, %v269_v50  ;;  %v277_v56 = vadd.f32 %v274_v54, %v270_v51  ;;  %v286_v57 = vadd.f32 %v284_v52, %v274_v54  ;;  %v287_v58 = vadd.f32 %v285_v53, %v274_v54 }
 0x1c6   :  { %v278_v59 = vmax.f32 %v276_v55, 0.0  ;;  %v279_v60 = vmax.f32 %v277_v56, 0.0  ;;  %v288_v61 = vmax.f32 %v286_v57, 0.0  ;;  %v289_v62 = vmax.f32 %v287_v58, 0.0 }
 0x1c8   :  { %280 = vst [vmem:[%s381_s5] sm:$0xff] %v278_v59  ;;  %281 = vst [vmem:[%s381_s5 + $0x8] sm:$0xff] %v279_v60 }
 0x1c9   :  { %298 = vst [vmem:[%s381_s5 + $0x10] sm:$0xff] %v288_v61  ;;  %299 = vst [vmem:[%s381_s5 + $0x18] sm:$0xff] %v289_v62 }

</bundles_post_ra>
